<compile_context>
chip_gen: v5e
topology: v5e:2x2
jax: 0.10.0
libtpu: 0.0.40
codegen_flags: <defaults>
</compile_context>

<pallas_src>
import functools

import jax
import jax.numpy as jnp
from jax.experimental import pallas as pl
from jax.experimental.pallas import tpu as pltpu

KERNEL_SIZE = 15
PADDING = 7
NEG_SLOPE = 0.1
BN_EPS = 1e-5
MAX_TILE_L = 4096  # upper cap; actual tile is derived from the per-generation budget


def _vmem_budget_bytes():
    """~75% of this generation's physical VMEM (conservative 48 MiB fallback)."""
    cap = 64 * 1024 * 1024
    try:
        info = pltpu.get_tpu_info()
        cap = int(getattr(info, "vmem_capacity_bytes", cap))
    except Exception:
        pass
    return (cap * 3) // 4


def _pick_tile(length, c_in, c_out, budget):
    """Largest lane-dense (multiple-of-128) L tile whose per-step working set
    (double-buffered x/out tiles + halo carry + im2col patch) fits well inside the
    per-generation VMEM budget."""
    bytes_per_col = 4 * (2 * c_in + 2 * c_out + c_in + c_in * KERNEL_SIZE)
    cap_cols = budget // (4 * max(bytes_per_col, 1))
    tile = min(MAX_TILE_L, max(256, (cap_cols // 128) * 128))
    if length <= tile:
        return length  # full-length block (always layout-legal)
    return tile


def _load_cur(x_ref, j, *, tile, length, n_tiles):
    """Load the current x tile; zero the out-of-range tail of the ragged last tile so it
    behaves like the Conv1d zero padding."""
    cur = x_ref[0]  # (C_in, tile)
    if length % tile != 0:
        jx = jnp.minimum(j, n_tiles - 1)
        col = jax.lax.broadcasted_iota(jnp.int32, cur.shape, 1)
        cur = jnp.where(col < (length - jx * tile), cur, 0.0)
    return cur


def _conv_tile(win, w_ref, *, k_size, tile):
    """One im2col MXU matmul: win (C_in, tile+2*pad) -> acc (C_out, tile) in f32."""
    patch = jnp.concatenate([win[:, k:k + tile] for k in range(k_size)], axis=0)
    return jnp.dot(w_ref[...], patch, preferred_element_type=jnp.float32)


def _stats_kernel(x_ref, w_ref, stats_ref, carry_ref, s1_ref, s2_ref, *,
                  k_size, pad, tile, length, n_tiles, c_in):
    # x_ref: (1, C_in, tile) tile j (clamped); w_ref: (C_out, K*C_in)
    # stats_ref: (1, C_out, 2) per-row [sum, sum_sq], written once at the last step
    # carry_ref: (C_in, tile + 2*pad) sliding halo window; s1/s2: (C_out, 1) accumulators
    j = pl.program_id(1)
    cur = _load_cur(x_ref, j, tile=tile, length=length, n_tiles=n_tiles)

    @pl.when(j == 0)
    def _init():
        carry_ref[:, :pad] = jnp.zeros((c_in, pad), jnp.float32)
        carry_ref[:, pad:pad + tile] = cur
        s1_ref[...] = jnp.zeros_like(s1_ref)
        s2_ref[...] = jnp.zeros_like(s2_ref)

    @pl.when(j > 0)
    def _step():
        is_last = j == n_tiles
        # Right halo = head of the next tile (zeros past the end of the signal).
        carry_ref[:, pad + tile:] = jnp.where(is_last, 0.0, cur[:, :pad])
        win = carry_ref[...]                                  # window for output tile j-1
        acc = _conv_tile(win, w_ref, k_size=k_size, tile=tile)
        if length % tile != 0:                                # mask ragged output tail
            limit = length - (j - 1) * tile
            col = jax.lax.broadcasted_iota(jnp.int32, acc.shape, 1)
            acc = jnp.where(col < limit, acc, 0.0)
        s1_ref[...] = s1_ref[...] + jnp.sum(acc, axis=1, keepdims=True)
        s2_ref[...] = s2_ref[...] + jnp.sum(acc * acc, axis=1, keepdims=True)
        # Slide the halo window: new left halo = last pad columns of tile j-1.
        carry_ref[:, :pad] = win[:, tile:tile + pad]
        carry_ref[:, pad:pad + tile] = cur

        @pl.when(is_last)
        def _finalize():
            stats_ref[0] = jnp.concatenate([s1_ref[...], s2_ref[...]], axis=1)


def _fused_conv_bn_kernel(x_ref, w_ref, scale_ref, shift_ref, o_ref, carry_ref, *,
                          k_size, pad, tile, length, n_tiles, c_in):
    # Recomputes the conv tile and applies folded BatchNorm + LeakyReLU in the epilogue.
    j = pl.program_id(1)
    cur = _load_cur(x_ref, j, tile=tile, length=length, n_tiles=n_tiles)

    @pl.when(j == 0)
    def _init():
        carry_ref[:, :pad] = jnp.zeros((c_in, pad), jnp.float32)
        carry_ref[:, pad:pad + tile] = cur

    @pl.when(j > 0)
    def _step():
        is_last = j == n_tiles
        carry_ref[:, pad + tile:] = jnp.where(is_last, 0.0, cur[:, :pad])
        win = carry_ref[...]
        acc = _conv_tile(win, w_ref, k_size=k_size, tile=tile)   # (C_out, tile)
        y = acc * scale_ref[...] + shift_ref[...]
        o_ref[0] = jnp.where(y >= 0, y, NEG_SLOPE * y).astype(o_ref.dtype)
        carry_ref[:, :pad] = win[:, tile:tile + pad]
        carry_ref[:, pad:pad + tile] = cur


def down_sampling_layer(x, weight, bias, gamma, beta, *, tile_l=None):
    """x: (N, C_in, L) f32; weight: (C_out, C_in, K); bias/gamma/beta: (C_out,).

    Training-mode BatchNorm semantics (batch statistics, biased variance), matching a
    freshly constructed PyTorch module called in its default (train) mode.
    """
    del bias  # exactly cancelled by training-mode BatchNorm mean subtraction
    n, c_in, length = x.shape
    c_out, _, k_size = weight.shape
    pad = PADDING

    budget = _vmem_budget_bytes()
    tile = tile_l if tile_l is not None else _pick_tile(length, c_in, c_out, budget)
    n_tiles = pl.cdiv(length, tile)
    grid = (n, n_tiles + 1)

    # (C_out, C_in, K) -> (C_out, K*C_in) with column index k*C_in + c (im2col order).
    w2d = jnp.transpose(weight, (0, 2, 1)).reshape(c_out, k_size * c_in)

    x_spec = pl.BlockSpec((1, c_in, tile),
                          lambda i, j: (i, 0, jnp.minimum(j, n_tiles - 1)))
    w_spec = pl.BlockSpec((c_out, k_size * c_in), lambda i, j: (0, 0))
    kern_kwargs = dict(k_size=k_size, pad=pad, tile=tile, length=length,
                       n_tiles=n_tiles, c_in=c_in)
    params = pltpu.CompilerParams(dimension_semantics=("parallel", "arbitrary"),
                                  vmem_limit_bytes=budget)

    # Pass 1: per-row BatchNorm partial statistics (no intermediate y written to HBM).
    stats = pl.pallas_call(
        functools.partial(_stats_kernel, **kern_kwargs),
        out_shape=jax.ShapeDtypeStruct((n, c_out, 2), jnp.float32),
        grid=grid,
        in_specs=[x_spec, w_spec],
        out_specs=pl.BlockSpec((1, c_out, 2), lambda i, j: (i, 0, 0)),
        scratch_shapes=[pltpu.VMEM((c_in, tile + 2 * pad), jnp.float32),
                        pltpu.VMEM((c_out, 1), jnp.float32),
                        pltpu.VMEM((c_out, 1), jnp.float32)],
        compiler_params=params,
    )(x, w2d)

    # Finalize BatchNorm statistics: tiny (C_out, 2) reduction + scalar math in XLA.
    totals = jnp.sum(stats, axis=0)                            # (C_out, 2)
    count = float(n * length)
    mean = totals[:, 0] / count
    var = jnp.maximum(totals[:, 1] / count - mean * mean, 0.0)
    inv = jax.lax.rsqrt(var + BN_EPS)
    g = gamma.astype(jnp.float32)
    scale = (g * inv).reshape(c_out, 1)
    shift = (beta.astype(jnp.float32) - mean * g * inv).reshape(c_out, 1)

    # Pass 2: recompute the conv tile, fuse scale/shift + LeakyReLU, write output once.
    out = pl.pallas_call(
        functools.partial(_fused_conv_bn_kernel, **kern_kwargs),
        out_shape=jax.ShapeDtypeStruct((n, c_out, length), jnp.float32),
        grid=grid,
        in_specs=[x_spec, w_spec,
                  pl.BlockSpec((c_out, 1), lambda i, j: (0, 0)),
                  pl.BlockSpec((c_out, 1), lambda i, j: (0, 0))],
        out_specs=pl.BlockSpec((1, c_out, tile),
                               lambda i, j: (i, 0, jnp.maximum(j - 1, 0))),
        scratch_shapes=[pltpu.VMEM((c_in, tile + 2 * pad), jnp.float32)],
        compiler_params=params,
    )(x, w2d, scale, shift)
    return out


def _reference(x, weight, bias, gamma, beta):
    y = jax.lax.conv_general_dilated(
        x, weight, window_strides=(1,), padding=[(PADDING, PADDING)],
        dimension_numbers=("NCH", "OIH", "NCH"),
    )
    y = y + bias[None, :, None]
    mean = y.mean(axis=(0, 2), keepdims=True)
    var = jnp.mean((y - mean) ** 2, axis=(0, 2), keepdims=True)
    y_hat = (y - mean) / jnp.sqrt(var + BN_EPS)
    out = y_hat * gamma[None, :, None] + beta[None, :, None]
    return jnp.where(out >= 0, out, NEG_SLOPE * out)


if __name__ == "__main__":
    N, C_IN, C_OUT, L = 2, 4, 8, 16

    key = jax.random.PRNGKey(0)
    kx, kw, kb, kg, kbe = jax.random.split(key, 5)
    x = jax.random.normal(kx, (N, C_IN, L), dtype=jnp.float32)
    weight = 0.1 * jax.random.normal(kw, (C_OUT, C_IN, KERNEL_SIZE), dtype=jnp.float32)
    bias = 0.1 * jax.random.normal(kb, (C_OUT,), dtype=jnp.float32)
    gamma = 1.0 + 0.1 * jax.random.normal(kg, (C_OUT,), dtype=jnp.float32)
    beta = 0.1 * jax.random.normal(kbe, (C_OUT,), dtype=jnp.float32)

    # Small single-tile case.
    out = down_sampling_layer(x, weight, bias, gamma, beta)
    jax.block_until_ready(out)
    ref = _reference(x, weight, bias, gamma, beta)
    assert out.shape == (N, C_OUT, L)
    assert jnp.allclose(out, ref, atol=1e-4, rtol=1e-4)

    # Multi-tile case exercising the halo carry + ragged-tail path (forced 128 tile).
    L2 = 300
    x2 = jax.random.normal(kx, (N, C_IN, L2), dtype=jnp.float32)
    out2 = down_sampling_layer(x2, weight, bias, gamma, beta, tile_l=128)
    jax.block_until_ready(out2)
    ref2 = _reference(x2, weight, bias, gamma, beta)
    assert out2.shape == (N, C_OUT, L2)
    assert jnp.allclose(out2, ref2, atol=1e-4, rtol=1e-4)

    print("KERNEL_OK")
</pallas_src>

<mosaic_0001>
module attributes {stable_mosaic.version = 11 : i64} {
  func.func @_stats_kernel(%arg0: i32, %arg1: i32, %arg2: memref<1x4x16xf32, #tpu.memory_space<vmem>>, %arg3: memref<8x60xf32, #tpu.memory_space<vmem>>, %arg4: memref<1x8x2xf32, #tpu.memory_space<vmem>>, %arg5: memref<4x30xf32, #tpu.memory_space<vmem>>, %arg6: memref<8x1xf32, #tpu.memory_space<vmem>>, %arg7: memref<8x1xf32, #tpu.memory_space<vmem>>) attributes {dimension_semantics = [#tpu.dimension_semantics<parallel>, #tpu.dimension_semantics<arbitrary>], iteration_bounds = array<i64: 2, 2>, scalar_prefetch = 0 : i64, scratch_operands = 3 : i64, tpu.core_type = #tpu.core_type<tc>, window_params = [{transform_indices = @transform_0, window_bounds = array<i64: 1, 4, 16>}, {pipeline_mode = #tpu.pipeline_mode<synchronous>, transform_indices = @transform_1, window_bounds = array<i64: 8, 60>}, {transform_indices = @transform_2, window_bounds = array<i64: 1, 8, 2>}]} {
    %c0 = arith.constant 0 : index
    %c0_0 = arith.constant 0 : index
    %c0_1 = arith.constant 0 : index
    %0 = vector.load %arg2[%c0, %c0_0, %c0_1] : memref<1x4x16xf32, #tpu.memory_space<vmem>>, vector<1x4x16xf32>
    %1 = vector.shape_cast %0 : vector<1x4x16xf32> to vector<4x16xf32>
    %c0_i32 = arith.constant 0 : i32
    %2 = arith.cmpi eq, %arg1, %c0_i32 : i32
    %3 = arith.extui %2 : i1 to i32
    %c0_i32_2 = arith.constant 0 : i32
    %4 = arith.cmpi ne, %3, %c0_i32_2 : i32
    scf.if %4 {
      %cst = arith.constant 0.000000e+00 : f32
      %8 = vector.broadcast %cst : f32 to vector<4x7xf32>
      %c0_5 = arith.constant 0 : index
      %c0_6 = arith.constant 0 : index
      %9 = vector.load %arg5[%c0_5, %c0_6] : memref<4x30xf32, #tpu.memory_space<vmem>>, vector<4x7xf32>
      tpu.vector_store %arg5[%c0_5, %c0_6], %8 {strides = array<i32>} : memref<4x30xf32, #tpu.memory_space<vmem>>, vector<4x7xf32>,
      %c0_7 = arith.constant 0 : index
      %c7 = arith.constant 7 : index
      %10 = vector.load %arg5[%c0_7, %c7] : memref<4x30xf32, #tpu.memory_space<vmem>>, vector<4x16xf32>
      tpu.vector_store %arg5[%c0_7, %c7], %1 {strides = array<i32>} : memref<4x30xf32, #tpu.memory_space<vmem>>, vector<4x16xf32>,
      %cst_8 = arith.constant 0.000000e+00 : f32
      %11 = vector.broadcast %cst_8 : f32 to vector<8x1xf32>
      %c0_9 = arith.constant 0 : index
      %c0_10 = arith.constant 0 : index
      %12 = vector.load %arg6[%c0_9, %c0_10] : memref<8x1xf32, #tpu.memory_space<vmem>>, vector<8x1xf32>
      tpu.vector_store %arg6[%c0_9, %c0_10], %11 {strides = array<i32>} : memref<8x1xf32, #tpu.memory_space<vmem>>, vector<8x1xf32>,
      %cst_11 = arith.constant 0.000000e+00 : f32
      %13 = vector.broadcast %cst_11 : f32 to vector<8x1xf32>
      %c0_12 = arith.constant 0 : index
      %c0_13 = arith.constant 0 : index
      %14 = vector.load %arg7[%c0_12, %c0_13] : memref<8x1xf32, #tpu.memory_space<vmem>>, vector<8x1xf32>
      tpu.vector_store %arg7[%c0_12, %c0_13], %13 {strides = array<i32>} : memref<8x1xf32, #tpu.memory_space<vmem>>, vector<8x1xf32>,
    } else {
    }
    %c0_i32_3 = arith.constant 0 : i32
    %5 = arith.cmpi sgt, %arg1, %c0_i32_3 : i32
    %6 = arith.extui %5 : i1 to i32
    %c0_i32_4 = arith.constant 0 : i32
    %7 = arith.cmpi ne, %6, %c0_i32_4 : i32
    scf.if %7 {
      %c1_i32 = arith.constant 1 : i32
      %8 = arith.cmpi eq, %arg1, %c1_i32 : i32
      %9 = vector.extract_strided_slice %1 {offsets = [0, 0], sizes = [4, 7], strides = [1, 1]} : vector<4x16xf32> to vector<4x7xf32>
      %cst = arith.constant 0.000000e+00 : f32
      %10 = vector.broadcast %cst : f32 to vector<4x7xf32>
      %11 = arith.select %8, %10, %9 : vector<4x7xf32>
      %c0_5 = arith.constant 0 : index
      %c23 = arith.constant 23 : index
      %12 = vector.load %arg5[%c0_5, %c23] : memref<4x30xf32, #tpu.memory_space<vmem>>, vector<4x7xf32>
      tpu.vector_store %arg5[%c0_5, %c23], %11 {strides = array<i32>} : memref<4x30xf32, #tpu.memory_space<vmem>>, vector<4x7xf32>,
      %c0_6 = arith.constant 0 : index
      %c0_7 = arith.constant 0 : index
      %13 = vector.load %arg5[%c0_6, %c0_7] : memref<4x30xf32, #tpu.memory_space<vmem>>, vector<4x30xf32>
      %14 = vector.extract_strided_slice %13 {offsets = [0, 0], sizes = [4, 16], strides = [1, 1]} : vector<4x30xf32> to vector<4x16xf32>
      %15 = vector.extract_strided_slice %13 {offsets = [0, 1], sizes = [4, 16], strides = [1, 1]} : vector<4x30xf32> to vector<4x16xf32>
      %16 = vector.extract_strided_slice %13 {offsets = [0, 2], sizes = [4, 16], strides = [1, 1]} : vector<4x30xf32> to vector<4x16xf32>
      %17 = vector.extract_strided_slice %13 {offsets = [0, 3], sizes = [4, 16], strides = [1, 1]} : vector<4x30xf32> to vector<4x16xf32>
      %18 = vector.extract_strided_slice %13 {offsets = [0, 4], sizes = [4, 16], strides = [1, 1]} : vector<4x30xf32> to vector<4x16xf32>
      %19 = vector.extract_strided_slice %13 {offsets = [0, 5], sizes = [4, 16], strides = [1, 1]} : vector<4x30xf32> to vector<4x16xf32>
      %20 = vector.extract_strided_slice %13 {offsets = [0, 6], sizes = [4, 16], strides = [1, 1]} : vector<4x30xf32> to vector<4x16xf32>
      %21 = vector.extract_strided_slice %13 {offsets = [0, 7], sizes = [4, 16], strides = [1, 1]} : vector<4x30xf32> to vector<4x16xf32>
      %22 = vector.extract_strided_slice %13 {offsets = [0, 8], sizes = [4, 16], strides = [1, 1]} : vector<4x30xf32> to vector<4x16xf32>
      %23 = vector.extract_strided_slice %13 {offsets = [0, 9], sizes = [4, 16], strides = [1, 1]} : vector<4x30xf32> to vector<4x16xf32>
      %24 = vector.extract_strided_slice %13 {offsets = [0, 10], sizes = [4, 16], strides = [1, 1]} : vector<4x30xf32> to vector<4x16xf32>
      %25 = vector.extract_strided_slice %13 {offsets = [0, 11], sizes = [4, 16], strides = [1, 1]} : vector<4x30xf32> to vector<4x16xf32>
      %26 = vector.extract_strided_slice %13 {offsets = [0, 12], sizes = [4, 16], strides = [1, 1]} : vector<4x30xf32> to vector<4x16xf32>
      %27 = vector.extract_strided_slice %13 {offsets = [0, 13], sizes = [4, 16], strides = [1, 1]} : vector<4x30xf32> to vector<4x16xf32>
      %28 = vector.extract_strided_slice %13 {offsets = [0, 14], sizes = [4, 16], strides = [1, 1]} : vector<4x30xf32> to vector<4x16xf32>
      %29 = tpu.concatenate %14, %15, %16, %17, %18, %19, %20, %21, %22, %23, %24, %25, %26, %27, %28 in 0 : vector<4x16xf32>, vector<4x16xf32>, vector<4x16xf32>, vector<4x16xf32>, vector<4x16xf32>, vector<4x16xf32>, vector<4x16xf32>, vector<4x16xf32>, vector<4x16xf32>, vector<4x16xf32>, vector<4x16xf32>, vector<4x16xf32>, vector<4x16xf32>, vector<4x16xf32>, vector<4x16xf32> -> vector<60x16xf32>
      %c0_8 = arith.constant 0 : index
      %c0_9 = arith.constant 0 : index
      %30 = vector.load %arg3[%c0_8, %c0_9] : memref<8x60xf32, #tpu.memory_space<vmem>>, vector<8x60xf32>
      %cst_10 = arith.constant dense<0.000000e+00> : vector<8x16xf32>
      %31 = tpu.matmul %30, %29, %cst_10 {dimension_numbers = #tpu.dot_dimension_numbers<[1], [0], [0], [1], [0, 0, 1, 1], [], []>} : vector<8x60xf32>, vector<60x16xf32>, vector<8x16xf32> -> vector<8x16xf32>
      %c0_11 = arith.constant 0 : index
      %c0_12 = arith.constant 0 : index
      %32 = vector.load %arg6[%c0_11, %c0_12] : memref<8x1xf32, #tpu.memory_space<vmem>>, vector<8x1xf32>
      %cst_13 = arith.constant dense<0.000000e+00> : vector<8xf32>
      %33 = vector.multi_reduction <add>, %31, %cst_13 [1] : vector<8x16xf32> to vector<8xf32>
      %34 = vector.shape_cast %33 : vector<8xf32> to vector<8x1xf32>
      %35 = arith.addf %32, %34 : vector<8x1xf32>
      %c0_14 = arith.constant 0 : index
      %c0_15 = arith.constant 0 : index
      %36 = vector.load %arg6[%c0_14, %c0_15] : memref<8x1xf32, #tpu.memory_space<vmem>>, vector<8x1xf32>
      tpu.vector_store %arg6[%c0_14, %c0_15], %35 {strides = array<i32>} : memref<8x1xf32, #tpu.memory_space<vmem>>, vector<8x1xf32>,
      %c0_16 = arith.constant 0 : index
      %c0_17 = arith.constant 0 : index
      %37 = vector.load %arg7[%c0_16, %c0_17] : memref<8x1xf32, #tpu.memory_space<vmem>>, vector<8x1xf32>
      %38 = arith.mulf %31, %31 : vector<8x16xf32>
      %cst_18 = arith.constant dense<0.000000e+00> : vector<8xf32>
      %39 = vector.multi_reduction <add>, %38, %cst_18 [1] : vector<8x16xf32> to vector<8xf32>
      %40 = vector.shape_cast %39 : vector<8xf32> to vector<8x1xf32>
      %41 = arith.addf %37, %40 : vector<8x1xf32>
      %c0_19 = arith.constant 0 : index
      %c0_20 = arith.constant 0 : index
      %42 = vector.load %arg7[%c0_19, %c0_20] : memref<8x1xf32, #tpu.memory_space<vmem>>, vector<8x1xf32>
      tpu.vector_store %arg7[%c0_19, %c0_20], %41 {strides = array<i32>} : memref<8x1xf32, #tpu.memory_space<vmem>>, vector<8x1xf32>,
      %43 = vector.extract_strided_slice %13 {offsets = [0, 16], sizes = [4, 7], strides = [1, 1]} : vector<4x30xf32> to vector<4x7xf32>
      %c0_21 = arith.constant 0 : index
      %c0_22 = arith.constant 0 : index
      %44 = vector.load %arg5[%c0_21, %c0_22] : memref<4x30xf32, #tpu.memory_space<vmem>>, vector<4x7xf32>
      tpu.vector_store %arg5[%c0_21, %c0_22], %43 {strides = array<i32>} : memref<4x30xf32, #tpu.memory_space<vmem>>, vector<4x7xf32>,
      %c0_23 = arith.constant 0 : index
      %c7 = arith.constant 7 : index
      %45 = vector.load %arg5[%c0_23, %c7] : memref<4x30xf32, #tpu.memory_space<vmem>>, vector<4x16xf32>
      tpu.vector_store %arg5[%c0_23, %c7], %1 {strides = array<i32>} : memref<4x30xf32, #tpu.memory_space<vmem>>, vector<4x16xf32>,
      %46 = arith.extui %8 : i1 to i32
      %c0_i32_24 = arith.constant 0 : i32
      %47 = arith.cmpi ne, %46, %c0_i32_24 : i32
      scf.if %47 {
        %c0_25 = arith.constant 0 : index
        %c0_26 = arith.constant 0 : index
        %48 = vector.load %arg6[%c0_25, %c0_26] : memref<8x1xf32, #tpu.memory_space<vmem>>, vector<8x1xf32>
        %c0_27 = arith.constant 0 : index
        %c0_28 = arith.constant 0 : index
        %49 = vector.load %arg7[%c0_27, %c0_28] : memref<8x1xf32, #tpu.memory_space<vmem>>, vector<8x1xf32>
        %50 = tpu.concatenate %48, %49 in 1 : vector<8x1xf32>, vector<8x1xf32> -> vector<8x2xf32>
        %c0_29 = arith.constant 0 : index
        %c0_30 = arith.constant 0 : index
        %c0_31 = arith.constant 0 : index
        %51 = vector.load %arg4[%c0_29, %c0_30, %c0_31] : memref<1x8x2xf32, #tpu.memory_space<vmem>>, vector<1x8x2xf32>
        %52 = vector.shape_cast %51 : vector<1x8x2xf32> to vector<8x2xf32>
        %53 = vector.shape_cast %50 : vector<8x2xf32> to vector<1x8x2xf32>
        tpu.vector_store %arg4[%c0_29, %c0_30, %c0_31], %53 {strides = array<i32>} : memref<1x8x2xf32, #tpu.memory_space<vmem>>, vector<1x8x2xf32>,
      } else {
      }
    } else {
    }
    return
  }
  func.func @transform_0(%arg0: i32, %arg1: i32) -> (i32, i32, i32) {
    %c0_i32 = arith.constant 0 : i32
    %0 = arith.minsi %arg1, %c0_i32 : i32
    %c0_i32_0 = arith.constant 0 : i32
    %c0_i32_1 = arith.constant 0 : i32
    return %arg0, %c0_i32_0, %0 : i32, i32, i32
  }
  func.func @transform_1(%arg0: i32, %arg1: i32) -> (i32, i32) {
    %c0_i32 = arith.constant 0 : i32
    %c0_i32_0 = arith.constant 0 : i32
    %c0_i32_1 = arith.constant 0 : i32
    return %c0_i32, %c0_i32_0 : i32, i32
  }
  func.func @transform_2(%arg0: i32, %arg1: i32) -> (i32, i32, i32) {
    %c0_i32 = arith.constant 0 : i32
    %c0_i32_0 = arith.constant 0 : i32
    %c0_i32_1 = arith.constant 0 : i32
    return %arg0, %c0_i32, %c0_i32_0 : i32, i32, i32
  }
}

</mosaic_0001>

<bundles_post_ra>
// kernel: tpu_custom_call.1
= control target key start
LH: loop header
LB: loop body
LE: loop exit
PB: predicated region body
PF: predicated region fallthrough
CT: control target
= control target key end

     0   :  { %7 = vsyncpa [#allocation6], 0  ;;  %s891_s0 = inlined_call_operand.hbm [shape: f32[2,4,16], index: 0, kind: input, shape index: {}]   ;;  %s892_s1 = inlined_call_operand.hbm [shape: f32[8,60], index: 1, kind: input, shape index: {}]   ;;  %s893_s2 = inlined_call_operand.vmem [shape: f32[2,8,2], index: 2, kind: output, shape index: {}]  }
   0x1   :  { %9 = vsyncpa [#allocation6 + $0x1], 0 }
   0x2   :  { %10 = vsyncpa [#allocation8], 0  ;;  %s722_s9 = smov 0   ;;  %s724_s10 = smov 0  }
   0x3   :  { %s726_s11 = smov 0   ;;  %s728_s12 = smov 0  }
   0x4   :  { %s730_s13 = smov 0   ;;  %s732_s14 = smov 0  }
   0x5   :  { %s734_s15 = smov 0   ;;  %s736_s16 = smov 0  }
   0x6 LB: > { %s434_s17 = sadd.s32 4294967295, %s684_s16   ;;  %p54_p0 = scmp.ne.s32.totalorder %s660_s10, %s656_s9  ;;  %s684_s16 = sphi %s736_s16, %s16_s16   ;;  %s680_s15 = sphi %s734_s15, %s904_s15   ;;  %s676_s14 = sphi %s732_s14, %s903_s14   ;;  %s672_s13 = sphi %s730_s13, %s902_s13   ;;  %s668_s12 = sphi %s728_s12, %s901_s12   ;;  %s664_s11 = sphi %s726_s11, %s900_s11   ;;  %s660_s10 = sphi %s724_s10, %s899_s10   ;;  %s656_s9 = sphi %s722_s9, %s898_s9  }
   0x7   : > { %p762_p1 = scmp.eq.s32.totalorder %s434_s17, 0  ;;  %p436_p2 = scmp.ge.s32.totalorder %s684_s16, 1 }
   0x8   : > { %p112_p3 = scmp.lt.s32.totalorder %s684_s16, 5  ;;  %s124_s22 = sshll.u32 %s892_s1, 4  ;;  %s125_s22 = int_to_ptr.hbm [resolvable:$true] %s124_s22 }
   0x9   : > { %p770_p4 = por %p762_p1, %p54_p0  ;;  %s686_s24 = smov [#allocation7]  }
   0xa   : > { %p777_p5 = pnand %p436_p2, %p112_p3  ;;  %s126_s25 = sshll.u32 %s686_s24, 4  ;;  %s127_s25 = int_to_ptr.vmem [resolvable:$true] %s126_s25 }
   0xb   : > { %s25_s26 = sadd.s32 1, %s676_s14  ;;  %s28_s27 = sadd.s32 1, %s680_s15 }
   0xc   : > { %p458_p6 = pneg %p777_p5  ;;  %p26_p8 = scmp.ge.s32.totalorder %s25_s26, 2 }
   0xd   : > { %s41_s28 = sadd.s32 1, %s664_s11  ;;  %p48_p10 = scmp.ne.s32.totalorder %s664_s11, %s660_s10 }
   0xe   : > { %p459_p7 = pnand %p458_p6, %p762_p1  ;;  %s906_s26 = smov (%p26_p8, %s25_s26), 0 }
   0xf   : > { %s908_s27 = smov (!%p26_p8, %s28_s27), %s680_s15  ;;  %p49_p11 = scmp.eq.s32.totalorder %s684_s16, 0 }
  0x10   : > { %461 = dma.hbm_to_vmem [thread:$0]  (!%p459_p7), %s125_s22, 128, %s127_s25, [#allocation8]  }
  0x11   : > { %p30_p9 = scmp.ge.s32.totalorder %s908_s27, 2  ;;  %p798_p12 = por %p49_p11, %p48_p10 }
  0x12   : > { %p467_p13 = scmp.lt.s32.totalorder %s684_s16, 4  ;;  %s137_s3 = sand.u32 1, %s664_s11  }
  0x13   : > { %s910_s27 = smov (%p30_p9, %s908_s27), 0  ;;  %s439_s4 = sshll.u32 %s137_s3, 2 }
  0x14   : > { %s36_s29 = ssub.s32 %s680_s15, %s910_s27  ;;  %s440_s6 = sshll.u32 %s680_s15, 2 }
  0x15   : > { %p39_p0 = scmp.eq.s32.totalorder %s36_s29, 0  ;;  %s148_s9 = scalar_lea.hbm %s891_s0, %s440_s6 }
  0x16   : > { %s141_s17 = scalar_lea.vmem [#allocation5], %s439_s4  ;;  %s150_s21 = sshll.u32 %s148_s9, 4  ;;  %s151_s21 = int_to_ptr.hbm [resolvable:$true] %s150_s21 }
  0x17   : > { %s805_s5 = scalar_select %p39_p0, %s664_s11, %s41_s28  }
  0x18   : > { %s152_s20 = sshll.u32 %s141_s17, 4  ;;  %p463_p2 = pnand %p467_p13, %p798_p12  ;;  %s153_s20 = int_to_ptr.vmem [resolvable:$true] %s152_s20 }
  0x19   : > { %s138_s22 = scalar_lea.sflag [#allocation6], %s137_s3  ;;  %s584_s24 = sshra.s32 %s151_s21, 4  ;;  %s585_s24 = int_to_ptr.hbm [resolvable:$true] %s584_s24 }
  0x1a   : > { %s586_s25 = scalar_lea.hbm %s585_s24, 4  ;;  %p588_p6 = pneg %p463_p2 }
  0x1b   : > { %p587_p3 = scmp.ne.s32.totalorder %s585_s24, %s586_s25  ;;  %s591_s7 = scalar_lea.hbm %s891_s0, 8 }
  0x1c   : > { %p593_p9 = scmp.lt.s32.totalorder %s591_s7, %s586_s25 }
  0x1d   : > { %p589_p7 = pnand %p588_p6, %p587_p3 }
  0x1f   : > { %p590_p8 = pneg %p589_p7 }
  0x21   : > { %p595_p10 = pnand %p593_p9, %p590_p8 }
  0x23   : > { %598 = shalt.err (!%p595_p10)
}
  0x24   : > { %465 = dma.hbm_to_vmem [thread:$0]  (!%p463_p2), %s151_s21, 64, %s153_s20, %s138_s22  }
  0x25   : > { %161 = sbr.rel (%p777_p5) target bundleno = 826 (0x33a), region = 28  ;;  %s163_s30 = sand.u32 (!%p777_p5), 1, %s660_s10  }
  0x26   : > { %s442_s3 = sshll.u32 (!%p777_p5), %s163_s30, 2  ;;  %s164_s4 = scalar_lea.sflag (!%p777_p5), [#allocation6], %s163_s30 }
  0x27   : > { %s167_s6 = scalar_lea.vmem (!%p777_p5), [#allocation5], %s442_s3 }
  0x2a   : > { %647 = dma.done.wait (%p770_p4), %s164_s4, 64  }
  0x2b   : > { %649 = vsyncadd (%p770_p4), %s164_s4, 4294967232 }
  0x2c   : > { %651 = dma.done.wait (%p762_p1), [#allocation8], 128  }
  0x2d   : > { %653 = vsyncadd (%p762_p1), [#allocation8], 4294967168  ;;  %p195_p5 = scmp.lt.s32.totalorder %s672_s13, 1  ;;  %v834_v0 = vld [vmem:[%s167_s6] sm:$0xf]  ;;  %p445_p4 = scmp.ne.s32.totalorder %s668_s12, 0 }
  0x2e   : > { %s687_s19 = smov (!%p445_p4), 7  }
  0x2f   : > { %s912_s13 = smov (!%p195_p5, %s672_s13), 1  ;;  %203 = sbr.rel (%p445_p4) target bundleno = 168 (0xa8), region = 40 }
  0x30   : > { %s444_s23 = sshll.u32 %s912_s13, 3 }
  0x31   : > { %s832_s17 = scalar_lea.vmem %s893_s2, %s444_s23 }
  0x34   : > { %vm204_vm0 = vcmask 52224   ;;  %207 = vrot.lane.b32.xlu0 %v834_v0, %s687_s19  ;;  %v688_v1 = vmov 0.0   ;;  %vm212_vm1 = vcmask 7168   ;;  %vm210_vm2 = vcmask 183352  }
  0x35   : > { %205 = vst.msk [vmem:[#allocation2] sm:$0xf] %vm204_vm0, %v688_v1 }
  0x36   : > { %213 = vst.msk [vmem:[#allocation3] sm:$0xff] %vm212_vm1, %v688_v1 }
  0x37   : > { %214 = vst.msk [vmem:[#allocation4] sm:$0xff] %vm212_vm1, %v688_v1 }
  0xa6   : > { %v208_v2 = vpop.permute.xlu0 %207 }
  0xa7   : > { %211 = vst.msk [vmem:[#allocation2] sm:$0xf] %vm210_vm2, %v208_v2 }
  0xa8 PF: > { %p446_p1 = scmp.le.s32.totalorder %s668_s12, 0 }
  0xa9   : > { %p219_p11 = scmp.eq.s32.totalorder (!%p446_p1), %s668_s12, 1  ;;  %s689_s18 = smov (!%p446_p1), 23  }
  0xaa   : > { %218 = sbr.rel (%p446_p1) target bundleno = 826 (0x33a), region = 44  ;;  %s690_s20 = smov (!%p446_p1), 118  }
  0xab   : > { %s691_s21 = smov (!%p446_p1), 116   ;;  %s692_s22 = smov (!%p446_p1), 114  }
  0xac   : > { %s693_s24 = smov (!%p446_p1), 122   ;;  %s694_s25 = smov (!%p446_p1), 124  }
  0xad   : > { %s695_s28 = smov (!%p446_p1), 120   ;;  %s696_s29 = smov (!%p446_p1), 117  }
  0xae   : > { %s697_s7 = smov (!%p446_p1), 115   ;;  %s698_s30 = smov (!%p446_p1), 121  }
  0xaf   : > { %s220_s13 = scalar_select %p219_p11, 1, 0  ;;  %vm228_vm4 = vcmask 240824   ;;  %vm274_vm5 = vcmask 1043456   ;;  %vm327_vm6 = vcmask 52224   ;;  %v282_v29 = vld [vmem:[#allocation7] sm:$0xff] }
  0xb0   : > { %s699_s3 = smov 123   ;;  %s700_s4 = smov 119   ;;  %vm283_vm7 = vcmask 490496   ;;  %vm310_vm8 = vcmask 130048   ;;  %vm333_vm9 = vcmask 183352   ;;  %v309_v36 = vld [vmem:[#allocation3] sm:$0xff] }
  0xb1   : > { %v221_v3 = vstv %s220_s13  ;;  %s701_s6 = smov 126   ;;  %s702_s23 = smov 127   ;;  %vm315_vm10 = vcmask 7168   ;;  %v317_v38 = vld [vmem:[#allocation4] sm:$0xff] }
  0xb2   : > { %vm222_vm3 = vcmp.eq.s32.totalorder %v221_v3, 1  ;;  %s703_s8 = smov 125   ;;  %s704_s9 = smov 112  }
  0xb3   : > { %v223_v4 = vsel %vm222_vm3, 0.0, %v834_v0  ;;  %s705_s19 = smov 7   ;;  %p449_p12 = scmp.ne.s32.totalorder %s668_s12, 1 }
  0xb4   : > { %225 = vrot.lane.b32.xlu0 %v223_v4, %s689_s18  ;;  %s706_s13 = smov (!%p449_p12), 1  }
 0x126   : > { %v226_v5 = vpop.permute.xlu0 %225 }
 0x127   : > { %229 = vst.msk [vmem:[#allocation2] sm:$0xf] %vm228_vm4, %v226_v5 }
 0x12e   : > { %v841_v6 = vld [vmem:[#allocation2] sm:$0xf] }
 0x12f   : > { %260 = vrot.lane.b32.xlu2 %v841_v6, %s690_s20  ;;  %266 = vrot.lane.b32.xlu1 %v841_v6, %s691_s21  ;;  %v232_v7 = vrot.slane %v841_v6, 4 }
 0x130   : > { %272 = vrot.lane.b32.xlu0 %v841_v6, %s692_s22 }
 0x137   : > { %248 = vrot.lane.b32.xlu2 %v841_v6, %s693_s24  ;;  %242 = vrot.lane.b32.xlu1 %v841_v6, %s694_s25 }
 0x138   : > { %254 = vrot.lane.b32.xlu0 %v841_v6, %s695_s28 }
 0x13f   : > { %263 = vrot.lane.b32.xlu2 %v232_v7, %s696_s29  ;;  %269 = vrot.lane.b32.xlu1 %v232_v7, %s697_s7 }
 0x140   : > { %251 = vrot.lane.b32.xlu0 %v232_v7, %s698_s30 }
 0x147   : > { %245 = vrot.lane.b32.xlu2 %v232_v7, %s699_s3  ;;  %257 = vrot.lane.b32.xlu1 %v232_v7, %s700_s4 }
 0x148   : > { %236 = vrot.lane.b32.xlu0 %v841_v6, %s701_s6 }
 0x14f   : > { %233 = vrot.lane.b32.xlu2 %v232_v7, %s702_s23  ;;  %239 = vrot.lane.b32.xlu1 %v232_v7, %s703_s8 }
 0x157   : > { %324 = vrot.lane.b32.xlu2 %v841_v6, %s704_s9 }
 0x15f   : > { %330 = vrot.lane.b32.xlu2 %v834_v0, %s705_s19 }
 0x189   : > { %v261_v8 = vpop.permute.xlu2 %260 }
 0x191   : > { %v249_v9 = vpop.permute.xlu2 %248 }
 0x199   : > { %v264_v10 = vpop.permute.xlu2 %263 }
 0x19a   : > { %v280_v20 = vsel %vm274_vm5, %v261_v8, %v264_v10 }
 0x1a1   : > { %v267_v11 = vpop.permute.xlu1 %266  ;;  %v246_v12 = vpop.permute.xlu2 %245 }
 0x1a2   : > { %v273_v13 = vpop.permute.xlu0 %272 }
 0x1a3   : > { %447 = vmatpush.msk.msra.mxu0 %vm274_vm5, %v273_v13 }
 0x1a9   : > { %v243_v14 = vpop.permute.xlu1 %242  ;;  %v234_v15 = vpop.permute.xlu2 %233 }
 0x1aa   : > { %v255_v16 = vpop.permute.xlu0 %254  ;;  %v277_v25 = vsel %vm274_vm5, %v243_v14, %v246_v12  ;;  %v275_v30 = vsel %vm274_vm5, %v841_v6, %v234_v15 }
 0x1b1   : > { %v325_v17 = vpop.permute.xlu2 %324  ;;  %v270_v18 = vpop.permute.xlu1 %269 }
 0x1b2   : > { %328 = vst.msk [vmem:[#allocation2] sm:$0xf] %vm327_vm6, %v325_v17  ;;  %v281_v19 = vsel %vm274_vm5, %v267_v11, %v270_v18  ;;  %v252_v21 = vpop.permute.xlu0 %251 }
 0x1b3   : > { %298 = vmatpush.msra.mxu0 %v281_v19  ;;  %v278_v24 = vsel %vm274_vm5, %v249_v9, %v252_v21 }
 0x1b5   : > { %299 = vmatpush.msra.mxu0 %v280_v20 }
 0x1b9   : > { %v258_v22 = vpop.permute.xlu1 %257  ;;  %v331_v35 = vpop.permute.xlu2 %330 }
 0x1ba   : > { %v279_v23 = vsel %vm274_vm5, %v255_v16, %v258_v22  ;;  %v237_v26 = vpop.permute.xlu0 %236  ;;  %334 = vst.msk [vmem:[#allocation2] sm:$0xf] %vm333_vm9, %v331_v35 }
 0x1bb   : > { %300 = vmatpush.msra.mxu0 %v279_v23 }
 0x1bd   : > { %301 = vmatpush.msra.mxu0 %v278_v24 }
 0x1bf   : > { %302 = vmatpush.msra.mxu0 %v277_v25 }
 0x1c1   : > { %v240_v27 = vpop.permute.xlu1 %239 }
 0x1c2   : > { %v276_v28 = vsel %vm274_vm5, %v237_v26, %v240_v27 }
 0x1c3   : > { %303 = vmatpush.msra.mxu0 %v276_v28 }
 0x1c5   : > { %304 = vmatpush.msra.mxu0 %v275_v30 }
 0x1c6   : > { %448 = vmatmul.msk.f32.vlgmr.msra.gmra.mxu0 %vm283_vm7, %v282_v29 }
 0x243   : > { %v306_v31 = vpop.f32.mrf.mxu0 }
 0x244   : > { %v318_v32 = vmul.f32 %v306_v31, %v306_v31  ;;  %v311_v33 = vsel %vm310_vm8, %v306_v31, 0.0 }
 0x245   : > { %312 = vadd.xlane.f32.xlu0 %v311_v33 }
 0x246   : > { %v319_v34 = vsel %vm310_vm8, %v318_v32, 0.0 }
 0x247   : > { %320 = vadd.xlane.f32.xlu1 %v319_v34 }
 0x2b8   : > { %v313_v37 = vpop.xlane.xlu0 %312 }
 0x2b9   : > { %v314_v39 = vadd.f32 %v313_v37, %v309_v36  ;;  %337 = sbr.rel (%p449_p12) target bundleno = 826 (0x33a), region = 48 }
 0x2ba   : > { %v321_v40 = vpop.xlane.xlu1 %320 }
 0x2bb   : > { %316 = vst.msk [vmem:[#allocation3] sm:$0xff] %vm315_vm10, %v314_v39  ;;  %v322_v41 = vadd.f32 %v321_v40, %v317_v38 }
 0x2bd   : > { %323 = vst.msk [vmem:[#allocation4] sm:$0xff] %vm315_vm10, %v322_v41 }
 0x2be   : > { %vm345_vm11 = vcmask 15360  }
 0x2c2   : > { %v338_v43 = vld [vmem:[#allocation3] sm:$0xff] }
 0x2c4   : > { %v339_v42 = vld [vmem:[#allocation4] sm:$0xff] }
 0x2c5   : > { %341 = vrot.lane.b32.xlu0 %v339_v42, %s706_s13 }
 0x337   : > { %v342_v44 = vpop.permute.xlu0 %341 }
 0x338   : > { %v344_v45 = vsel %vm315_vm10, %v338_v43, %v342_v44 }
 0x339   : > { %346 = vst.msk [vmem:[%s832_s17] sm:$0xff] %vm345_vm11, %v344_v45 }
 0x33a PF: > { %s16_s16 = sadd.s32 1, %s684_s16   ;;  %s898_s9 = smov %s660_s10 }
 0x33b   : > { %p13_p13 = scmp.ge.s32.totalorder %s16_s16, 6   ;;  %s899_s10 = smov %s664_s11 }
 0x33c   : > { %s900_s11 = smov %s805_s5  ;;  %s901_s12 = smov %s676_s14 }
 0x33d   : > { %s902_s13 = smov %s680_s15  ;;  %s903_s14 = smov %s906_s26 }
 0x33e   : > { %s904_s15 = smov %s910_s27  ;;  %15 = sbr.rel (!%p13_p13) target bundleno = 6 (0x6), region = 84 }
 0x343   :  { %366 = vsyncpa [#allocation6], 1 }
 0x344   :  { %368 = vsyncpa [#allocation6 + $0x1], 1 }
 0x345   :  { %369 = vsyncpa [#allocation8], 1 }

</bundles_post_ra>
